<compile_context>
chip_gen: v7x
topology: tpu7x:2x2x1
jax: 0.10.0
libtpu: 0.0.40
codegen_flags: <defaults>
</compile_context>

<pallas_src>
import jax
import jax.numpy as jnp
from jax.experimental import pallas as pl
from jax.experimental.pallas import tpu as pltpu


def _round_up(x, m):
    return (x + m - 1) // m * m


def _vmem_capacity_bytes():
    try:
        cap = getattr(pltpu.get_tpu_info(), "vmem_capacity_bytes", None)
        if cap:
            return int(cap)
    except Exception:
        pass
    return 64 * 1024 * 1024          # conservative fallback (v7x per-TC VMEM)


def _kernel_vmem_bytes(n_pad, tm, g, f_in, f_hid, f_fc1, d_pad, a_resident):
    """Conservative VMEM estimate (all pipeline blocks counted double-buffered)."""
    bf, f32 = 2, 4
    a_rows = n_pad if a_resident else tm
    buffers = 2 * (
        a_rows * n_pad * bf                              # A_hat block(s)
        + n_pad * f_in * bf                              # X (resident)
        + g * n_pad * bf                                 # P (resident, bf16)
        + (f_in + 2 * f_hid) * f_hid * bf                # conv weights (bf16)
        + (f_hid * f_fc1 + f_fc1 * d_pad) * f32          # fc weights (f32)
        + (3 * f_hid + f_fc1 + d_pad) * f32              # biases (f32)
        + g * d_pad * f32                                # output block
    )
    scratch = 3 * n_pad * f_hid * bf                     # hw_a, hw_b, h (bf16)
    return buffers + scratch


# ---------------------------- fused Pallas kernel ----------------------------

def _make_kernel(tm, n_tiles, a_resident):
    bf16 = jnp.bfloat16

    def kernel(a_ref, x_ref, w1_ref, b1_ref, w2_ref, b2_ref, w3_ref, b3_ref,
               p_ref, fc1w_ref, fc1b_ref, fc2w_ref, fc2b_ref,
               out_ref, hwa_ref, hwb_ref, h_ref):
        layer = pl.program_id(0)
        tile = pl.program_id(1)
        row0 = pl.multiple_of(tile * tm, tm)
        rows = pl.ds(row0, tm)

        # ---- one-time XW1 precompute (K = f_in, chunked so the f32 temp stays tm x 128) ----
        @pl.when((layer == 0) & (tile == 0))
        def _():
            @pl.loop(0, n_tiles)
            def _(c):
                r0 = pl.multiple_of(c * tm, tm)
                hwa_ref[pl.ds(r0, tm), :] = jnp.dot(
                    x_ref[pl.ds(r0, tm), :], w1_ref[...],
                    preferred_element_type=jnp.float32).astype(bf16)

        def a_tile():
            # Resident A: slice the full VMEM-resident matrix; streamed A: whole block.
            return a_ref[rows, :] if a_resident else a_ref[...]

        def conv_step(hw_in_ref, b_ref, hw_out_ref=None, w_next_ref=None):
            agg = jnp.dot(a_tile(), hw_in_ref[...], preferred_element_type=jnp.float32)
            h_new = jnp.maximum(agg + b_ref[...], 0.0)
            if hw_out_ref is not None:
                # Fuse the NEXT layer's HW = h @ W_next for this row tile (no tile-0 bubble).
                hw_out_ref[rows, :] = jnp.dot(
                    h_new.astype(bf16), w_next_ref[...],
                    preferred_element_type=jnp.float32).astype(bf16)
            else:
                h_ref[rows, :] = h_new.astype(bf16)      # final layer: keep h for pooling

        @pl.when(layer == 0)
        def _():
            conv_step(hwa_ref, b1_ref, hwb_ref, w2_ref)   # reads XW1, writes H1@W2

        @pl.when(layer == 1)
        def _():
            conv_step(hwb_ref, b2_ref, hwa_ref, w3_ref)   # reads H1@W2, writes H2@W3

        @pl.when(layer == 2)
        def _():
            conv_step(hwa_ref, b3_ref)                    # reads H2@W3, writes h3 (bf16)

        # -------- epilogue: global_mean_pool + fc1 + relu + fc2 (lane-dense output) --------
        @pl.when((layer == 2) & (tile == n_tiles - 1))
        def _():
            hg = jnp.dot(p_ref[...], h_ref[...], preferred_element_type=jnp.float32)
            h1 = jnp.maximum(
                jnp.dot(hg, fc1w_ref[...], preferred_element_type=jnp.float32)
                + fc1b_ref[...], 0.0)
            out_ref[...] = (jnp.dot(h1, fc2w_ref[...],
                                    preferred_element_type=jnp.float32)
                            + fc2b_ref[...])

    return kernel


def gcn_forward(params, x, a_hat, p, *, row_tile=None, residency=None):
    """Fused GCN forward: one pallas_call for all 3 conv layers + pooled head."""
    n, f_in = x.shape
    g = p.shape[0]
    f_hid = params["gc1_w"].shape[1]     # 128
    f_fc1 = params["fc1_w"].shape[1]     # 64
    dim_out = params["fc2_w"].shape[1]

    cap = _vmem_capacity_bytes()
    if row_tile is None:
        # Larger tiles amortize per-step overhead on 128 MiB parts; keep tighter on 64 MiB.
        row_tile = 512 if cap >= 96 * 1024 * 1024 else 256

    # Row-tile size: multiple of 16 (bf16 sublane tile); single tile for small N.
    tm = _round_up(min(int(row_tile), _round_up(n, 16)), 16)
    n_pad = _round_up(n, tm)
    n_tiles = n_pad // tm
    d_pad = _round_up(dim_out, 128)      # lane-dense fc2 output, sliced below

    if residency is None:
        residency = _kernel_vmem_bytes(
            n_pad, tm, g, f_in, f_hid, f_fc1, d_pad, True) <= int(0.80 * cap)
    a_resident = bool(residency)

    est = _kernel_vmem_bytes(n_pad, tm, g, f_in, f_hid, f_fc1, d_pad, a_resident)
    vmem_limit = min(int(0.92 * cap), max(est + (8 << 20), 32 << 20))

    bf16 = jnp.bfloat16
    # Pad directly in bf16 (no n_pad^2 f32 transient). Padded rows/cols are zero; P has zero
    # weight on padded nodes, so they never influence real outputs (see NOTE at top of file).
    a_p = jnp.pad(a_hat.astype(bf16), ((0, n_pad - n), (0, n_pad - n)))
    x_p = jnp.pad(x.astype(bf16), ((0, n_pad - n), (0, 0)))
    p_p = jnp.pad(p.astype(bf16), ((0, 0), (0, n_pad - n)))
    fc2_w = jnp.pad(params["fc2_w"], ((0, 0), (0, d_pad - dim_out)))
    fc2_b = jnp.pad(params["fc2_b"], ((0, 0), (0, d_pad - dim_out)))

    const = lambda l, i: (0, 0)
    if a_resident:
        a_spec = pl.BlockSpec((n_pad, n_pad), const)               # DMA'd once, resident
    else:
        a_spec = pl.BlockSpec((tm, n_pad), lambda l, i: (i, 0))    # streamed row tiles

    grid_spec = pltpu.PrefetchScalarGridSpec(
        num_scalar_prefetch=0,
        grid=(3, n_tiles),                                         # (layer, row-tile)
        in_specs=[
            a_spec,                                                # A_hat (bf16)
            pl.BlockSpec((n_pad, f_in), const),                    # X (bf16, resident)
            pl.BlockSpec((f_in, f_hid), const),                    # W1 (bf16)
            pl.BlockSpec((1, f_hid), const),                       # b1
            pl.BlockSpec((f_hid, f_hid), const),                   # W2 (bf16)
            pl.BlockSpec((1, f_hid), const),                       # b2
            pl.BlockSpec((f_hid, f_hid), const),                   # W3 (bf16)
            pl.BlockSpec((1, f_hid), const),                       # b3
            pl.BlockSpec((g, n_pad), const),                       # P (bf16)
            pl.BlockSpec((f_hid, f_fc1), const),                   # fc1 W (f32)
            pl.BlockSpec((1, f_fc1), const),                       # fc1 b
            pl.BlockSpec((f_fc1, d_pad), const),                   # fc2 W (lane-padded)
            pl.BlockSpec((1, d_pad), const),                       # fc2 b (lane-padded)
        ],
        out_specs=pl.BlockSpec((g, d_pad), const),
        scratch_shapes=[
            pltpu.VMEM((n_pad, f_hid), bf16),                      # hw_a (XW1 / H2@W3)
            pltpu.VMEM((n_pad, f_hid), bf16),                      # hw_b (H1@W2)
            pltpu.VMEM((n_pad, f_hid), bf16),                      # h (final layer, pooled)
        ],
    )

    out_p = pl.pallas_call(
        _make_kernel(tm, n_tiles, a_resident),
        out_shape=jax.ShapeDtypeStruct((g, d_pad), jnp.float32),
        grid_spec=grid_spec,
        compiler_params=pltpu.CompilerParams(
            # Layers are sequential and row tiles share the per-core VMEM scratches,
            # so both axes must remain "arbitrary" for this fused kernel.
            dimension_semantics=("arbitrary", "arbitrary"),
            vmem_limit_bytes=vmem_limit,
        ),
    )(a_p, x_p,
      params["gc1_w"].astype(bf16), params["gc1_b"],
      params["gc2_w"].astype(bf16), params["gc2_b"],
      params["gc3_w"].astype(bf16), params["gc3_b"],
      p_p,
      params["fc1_w"], params["fc1_b"], fc2_w, fc2_b)

    return out_p[:, :dim_out]


# ---------------- Plain-JAX glue (graph preprocessing, parameter setup) ----------------

def build_norm_adj(edge_index, n):
    """Dense symmetric GCN normalization: D^-1/2 (A + I) D^-1/2."""
    a = jnp.zeros((n, n), jnp.float32)
    a = a.at[edge_index[1], edge_index[0]].set(1.0)
    a = a + jnp.eye(n, dtype=jnp.float32)            # add self-loops
    deg = a.sum(axis=1)
    dinv = jax.lax.rsqrt(jnp.maximum(deg, 1e-12))
    return a * dinv[:, None] * dinv[None, :]


def build_pool_matrix(batch, num_graphs):
    """P[g, n] = 1/|graph g| if batch[n]==g else 0  (global_mean_pool)."""
    onehot = (batch[None, :] == jnp.arange(num_graphs)[:, None]).astype(jnp.float32)
    counts = jnp.maximum(onehot.sum(axis=1, keepdims=True), 1.0)
    return onehot / counts


def init_params(key, n_node_feats, dim_out):
    ks = jax.random.split(key, 10)

    def w(k, fan_in, fan_out):
        return (jax.random.normal(k, (fan_in, fan_out), jnp.float32)
                * jnp.sqrt(2.0 / (fan_in + fan_out)))

    def b(k, fan_out):
        return 0.01 * jax.random.normal(k, (1, fan_out), jnp.float32)

    return {
        "gc1_w": w(ks[0], n_node_feats, 128), "gc1_b": b(ks[1], 128),
        "gc2_w": w(ks[2], 128, 128),          "gc2_b": b(ks[3], 128),
        "gc3_w": w(ks[4], 128, 128),          "gc3_b": b(ks[5], 128),
        "fc1_w": w(ks[6], 128, 64),           "fc1_b": b(ks[7], 64),
        "fc2_w": w(ks[8], 64, dim_out),       "fc2_b": b(ks[9], dim_out),
    }


def gcn_forward_ref(params, x, a_hat, p, *, cast_bf16):
    """Pure-JAX reference. cast_bf16=True mirrors the kernel's MXU-operand casts exactly."""
    f32 = jnp.float32
    cast = (lambda t: t.astype(jnp.bfloat16)) if cast_bf16 else (lambda t: t)
    a = cast(a_hat)
    hw = cast(jnp.dot(cast(x), cast(params["gc1_w"]), preferred_element_type=f32))
    h = jnp.maximum(jnp.dot(a, hw, preferred_element_type=f32) + params["gc1_b"], 0.0)
    for w_, b_ in ((params["gc2_w"], params["gc2_b"]),
                   (params["gc3_w"], params["gc3_b"])):
        hw = cast(jnp.dot(cast(h), cast(w_), preferred_element_type=f32))
        h = jnp.maximum(jnp.dot(a, hw, preferred_element_type=f32) + b_, 0.0)
    hg = jnp.dot(cast(p), cast(h), preferred_element_type=f32)
    h1 = jnp.maximum(jnp.dot(hg, params["fc1_w"], preferred_element_type=f32)
                     + params["fc1_b"], 0.0)
    return jnp.dot(h1, params["fc2_w"], preferred_element_type=f32) + params["fc2_b"]


if __name__ == "__main__":
    key = jax.random.PRNGKey(0)
    k_x, k_p = jax.random.split(key)

    # Small synthetic batch: 2 graphs of 32 nodes each (64 nodes total).
    n_node_feats = 32
    dim_out = 8
    nodes_per_graph = 32
    num_graphs = 2
    num_nodes = nodes_per_graph * num_graphs

    x = jax.random.normal(k_x, (num_nodes, n_node_feats), jnp.float32)
    batch = jnp.repeat(jnp.arange(num_graphs, dtype=jnp.int32), nodes_per_graph)

    # Undirected ring inside each graph (both edge directions, PyG style).
    src, dst = [], []
    for gph in range(num_graphs):
        base = gph * nodes_per_graph
        for i in range(nodes_per_graph):
            a_, b_ = base + i, base + (i + 1) % nodes_per_graph
            src += [a_, b_]
            dst += [b_, a_]
    edge_index = jnp.array([src, dst], dtype=jnp.int32)   # [2, E]

    a_hat = build_norm_adj(edge_index, num_nodes)
    p_mat = build_pool_matrix(batch, num_graphs)
    params = init_params(k_p, n_node_feats, dim_out)

    # row_tile=16 -> 4 row tiles: exercises the tiled grid path at small N.
    # Run both the VMEM-resident-A path and the streamed-A path, plus the auto config.
    out_res = gcn_forward(params, x, a_hat, p_mat, row_tile=16, residency=True)
    out_str = gcn_forward(params, x, a_hat, p_mat, row_tile=16, residency=False)
    out_auto = gcn_forward(params, x, a_hat, p_mat)
    jax.block_until_ready((out_res, out_str, out_auto))

    ref_bf16 = gcn_forward_ref(params, x, a_hat, p_mat, cast_bf16=True)
    ref_f32 = gcn_forward_ref(params, x, a_hat, p_mat, cast_bf16=False)

    for name, out in (("resident", out_res), ("streamed", out_str), ("auto", out_auto)):
        assert out.shape == (num_graphs, dim_out)
        assert jnp.allclose(out, ref_bf16, atol=5e-3, rtol=5e-3), \
            f"{name}: Pallas output mismatch vs bf16-mirrored reference"
        assert jnp.allclose(out, ref_f32, atol=1e-1, rtol=1e-1), \
            f"{name}: Pallas output mismatch vs f32 reference"

    print("KERNEL_OK")
</pallas_src>

<mosaic_0001>
module attributes {stable_mosaic.version = 11 : i64} {
  func.func @kernel(%arg0: i32, %arg1: i32, %arg2: memref<64x64xbf16, #tpu.memory_space<vmem>>, %arg3: memref<64x32xbf16, #tpu.memory_space<vmem>>, %arg4: memref<32x128xbf16, #tpu.memory_space<vmem>>, %arg5: memref<1x128xf32, #tpu.memory_space<vmem>>, %arg6: memref<128x128xbf16, #tpu.memory_space<vmem>>, %arg7: memref<1x128xf32, #tpu.memory_space<vmem>>, %arg8: memref<128x128xbf16, #tpu.memory_space<vmem>>, %arg9: memref<1x128xf32, #tpu.memory_space<vmem>>, %arg10: memref<2x64xbf16, #tpu.memory_space<vmem>>, %arg11: memref<128x64xf32, #tpu.memory_space<vmem>>, %arg12: memref<1x64xf32, #tpu.memory_space<vmem>>, %arg13: memref<64x128xf32, #tpu.memory_space<vmem>>, %arg14: memref<1x128xf32, #tpu.memory_space<vmem>>, %arg15: memref<2x128xf32, #tpu.memory_space<vmem>>, %arg16: memref<64x128xbf16, #tpu.memory_space<vmem>>, %arg17: memref<64x128xbf16, #tpu.memory_space<vmem>>, %arg18: memref<64x128xbf16, #tpu.memory_space<vmem>>) attributes {dimension_semantics = [#tpu.dimension_semantics<arbitrary>, #tpu.dimension_semantics<arbitrary>], iteration_bounds = array<i64: 3, 4>, scalar_prefetch = 0 : i64, scratch_operands = 3 : i64, tpu.core_type = #tpu.core_type<tc>, window_params = [{pipeline_mode = #tpu.pipeline_mode<synchronous>, transform_indices = @transform_0, window_bounds = array<i64: 64, 64>}, {pipeline_mode = #tpu.pipeline_mode<synchronous>, transform_indices = @transform_1, window_bounds = array<i64: 64, 32>}, {pipeline_mode = #tpu.pipeline_mode<synchronous>, transform_indices = @transform_2, window_bounds = array<i64: 32, 128>}, {pipeline_mode = #tpu.pipeline_mode<synchronous>, transform_indices = @transform_3, window_bounds = array<i64: 1, 128>}, {pipeline_mode = #tpu.pipeline_mode<synchronous>, transform_indices = @transform_4, window_bounds = array<i64: 128, 128>}, {pipeline_mode = #tpu.pipeline_mode<synchronous>, transform_indices = @transform_5, window_bounds = array<i64: 1, 128>}, {pipeline_mode = #tpu.pipeline_mode<synchronous>, transform_indices = @transform_6, window_bounds = array<i64: 128, 128>}, {pipeline_mode = #tpu.pipeline_mode<synchronous>, transform_indices = @transform_7, window_bounds = array<i64: 1, 128>}, {pipeline_mode = #tpu.pipeline_mode<synchronous>, transform_indices = @transform_8, window_bounds = array<i64: 2, 64>}, {pipeline_mode = #tpu.pipeline_mode<synchronous>, transform_indices = @transform_9, window_bounds = array<i64: 128, 64>}, {pipeline_mode = #tpu.pipeline_mode<synchronous>, transform_indices = @transform_10, window_bounds = array<i64: 1, 64>}, {pipeline_mode = #tpu.pipeline_mode<synchronous>, transform_indices = @transform_11, window_bounds = array<i64: 64, 128>}, {pipeline_mode = #tpu.pipeline_mode<synchronous>, transform_indices = @transform_12, window_bounds = array<i64: 1, 128>}, {pipeline_mode = #tpu.pipeline_mode<synchronous>, transform_indices = @transform_13, window_bounds = array<i64: 2, 128>}]} {
    %c16_i32 = arith.constant 16 : i32
    %0 = arith.muli %arg1, %c16_i32 : i32
    %1 = tpu.assume_multiple %0, 16 : i32
    %c0_i32 = arith.constant 0 : i32
    %2 = arith.cmpi eq, %arg0, %c0_i32 : i32
    %c0_i32_0 = arith.constant 0 : i32
    %3 = arith.cmpi eq, %arg1, %c0_i32_0 : i32
    %4 = arith.andi %2, %3 : i1
    %5 = arith.extui %4 : i1 to i32
    %c0_i32_1 = arith.constant 0 : i32
    %6 = arith.cmpi ne, %5, %c0_i32_1 : i32
    scf.if %6 {
      %c0_i32_8 = arith.constant 0 : i32
      %c4_i32 = arith.constant 4 : i32
      %21 = arith.addi %c0_i32_8, %c4_i32 : i32
      %c1_i32_9 = arith.constant 1 : i32
      scf.for %arg19 = %c0_i32_8 to %21 step %c1_i32_9  : i32 {
        %c1_i32_11 = arith.constant 1 : i32
        %22 = arith.muli %arg19, %c1_i32_11 : i32
        %c0_i32_12 = arith.constant 0 : i32
        %23 = arith.addi %c0_i32_12, %22 : i32
        %c16_i32_13 = arith.constant 16 : i32
        %24 = arith.muli %23, %c16_i32_13 : i32
        %25 = tpu.assume_multiple %24, 16 : i32
        %26 = arith.index_cast %25 : i32 to index
        %c0 = arith.constant 0 : index
        %27 = vector.load %arg3[%26, %c0] : memref<64x32xbf16, #tpu.memory_space<vmem>>, vector<16x32xbf16>
        %c0_14 = arith.constant 0 : index
        %c0_15 = arith.constant 0 : index
        %28 = vector.load %arg4[%c0_14, %c0_15] : memref<32x128xbf16, #tpu.memory_space<vmem>>, vector<32x128xbf16>
        %cst = arith.constant dense<0.000000e+00> : vector<16x128xf32>
        %29 = tpu.matmul %27, %28, %cst {dimension_numbers = #tpu.dot_dimension_numbers<[1], [0], [0], [1], [0, 0, 1, 1], [], []>} : vector<16x32xbf16>, vector<32x128xbf16>, vector<16x128xf32> -> vector<16x128xf32>
        %30 = arith.truncf %29 : vector<16x128xf32> to vector<16x128xbf16>
        %31 = arith.index_cast %25 : i32 to index
        %c0_16 = arith.constant 0 : index
        %32 = vector.load %arg16[%31, %c0_16] : memref<64x128xbf16, #tpu.memory_space<vmem>>, vector<16x128xbf16>
        tpu.vector_store %arg16[%31, %c0_16], %30 {strides = array<i32>} : memref<64x128xbf16, #tpu.memory_space<vmem>>, vector<16x128xbf16>,
      }
      %c4_i32_10 = arith.constant 4 : i32
    } else {
    }
    %c0_i32_2 = arith.constant 0 : i32
    %7 = arith.cmpi eq, %arg0, %c0_i32_2 : i32
    %8 = arith.extui %7 : i1 to i32
    %c0_i32_3 = arith.constant 0 : i32
    %9 = arith.cmpi ne, %8, %c0_i32_3 : i32
    scf.if %9 {
      %21 = arith.index_cast %1 : i32 to index
      %c0 = arith.constant 0 : index
      %22 = vector.load %arg2[%21, %c0] : memref<64x64xbf16, #tpu.memory_space<vmem>>, vector<16x64xbf16>
      %c0_8 = arith.constant 0 : index
      %c0_9 = arith.constant 0 : index
      %23 = vector.load %arg16[%c0_8, %c0_9] : memref<64x128xbf16, #tpu.memory_space<vmem>>, vector<64x128xbf16>
      %cst = arith.constant dense<0.000000e+00> : vector<16x128xf32>
      %24 = tpu.matmul %22, %23, %cst {dimension_numbers = #tpu.dot_dimension_numbers<[1], [0], [0], [1], [0, 0, 1, 1], [], []>} : vector<16x64xbf16>, vector<64x128xbf16>, vector<16x128xf32> -> vector<16x128xf32>
      %c0_10 = arith.constant 0 : index
      %c0_11 = arith.constant 0 : index
      %25 = vector.load %arg5[%c0_10, %c0_11] : memref<1x128xf32, #tpu.memory_space<vmem>>, vector<1x128xf32>
      %26 = vector.broadcast %25 : vector<1x128xf32> to vector<16x128xf32>
      %27 = arith.addf %24, %26 : vector<16x128xf32>
      %cst_12 = arith.constant 0.000000e+00 : f32
      %28 = vector.broadcast %cst_12 : f32 to vector<16x128xf32>
      %29 = arith.maximumf %27, %28 : vector<16x128xf32>
      %30 = arith.truncf %29 : vector<16x128xf32> to vector<16x128xbf16>
      %c0_13 = arith.constant 0 : index
      %c0_14 = arith.constant 0 : index
      %31 = vector.load %arg6[%c0_13, %c0_14] : memref<128x128xbf16, #tpu.memory_space<vmem>>, vector<128x128xbf16>
      %cst_15 = arith.constant dense<0.000000e+00> : vector<16x128xf32>
      %32 = tpu.matmul %30, %31, %cst_15 {dimension_numbers = #tpu.dot_dimension_numbers<[1], [0], [0], [1], [0, 0, 1, 1], [], []>} : vector<16x128xbf16>, vector<128x128xbf16>, vector<16x128xf32> -> vector<16x128xf32>
      %33 = arith.truncf %32 : vector<16x128xf32> to vector<16x128xbf16>
      %34 = arith.index_cast %1 : i32 to index
      %c0_16 = arith.constant 0 : index
      %35 = vector.load %arg17[%34, %c0_16] : memref<64x128xbf16, #tpu.memory_space<vmem>>, vector<16x128xbf16>
      tpu.vector_store %arg17[%34, %c0_16], %33 {strides = array<i32>} : memref<64x128xbf16, #tpu.memory_space<vmem>>, vector<16x128xbf16>,
    } else {
    }
    %c1_i32 = arith.constant 1 : i32
    %10 = arith.cmpi eq, %arg0, %c1_i32 : i32
    %11 = arith.extui %10 : i1 to i32
    %c0_i32_4 = arith.constant 0 : i32
    %12 = arith.cmpi ne, %11, %c0_i32_4 : i32
    scf.if %12 {
      %21 = arith.index_cast %1 : i32 to index
      %c0 = arith.constant 0 : index
      %22 = vector.load %arg2[%21, %c0] : memref<64x64xbf16, #tpu.memory_space<vmem>>, vector<16x64xbf16>
      %c0_8 = arith.constant 0 : index
      %c0_9 = arith.constant 0 : index
      %23 = vector.load %arg17[%c0_8, %c0_9] : memref<64x128xbf16, #tpu.memory_space<vmem>>, vector<64x128xbf16>
      %cst = arith.constant dense<0.000000e+00> : vector<16x128xf32>
      %24 = tpu.matmul %22, %23, %cst {dimension_numbers = #tpu.dot_dimension_numbers<[1], [0], [0], [1], [0, 0, 1, 1], [], []>} : vector<16x64xbf16>, vector<64x128xbf16>, vector<16x128xf32> -> vector<16x128xf32>
      %c0_10 = arith.constant 0 : index
      %c0_11 = arith.constant 0 : index
      %25 = vector.load %arg7[%c0_10, %c0_11] : memref<1x128xf32, #tpu.memory_space<vmem>>, vector<1x128xf32>
      %26 = vector.broadcast %25 : vector<1x128xf32> to vector<16x128xf32>
      %27 = arith.addf %24, %26 : vector<16x128xf32>
      %cst_12 = arith.constant 0.000000e+00 : f32
      %28 = vector.broadcast %cst_12 : f32 to vector<16x128xf32>
      %29 = arith.maximumf %27, %28 : vector<16x128xf32>
      %30 = arith.truncf %29 : vector<16x128xf32> to vector<16x128xbf16>
      %c0_13 = arith.constant 0 : index
      %c0_14 = arith.constant 0 : index
      %31 = vector.load %arg8[%c0_13, %c0_14] : memref<128x128xbf16, #tpu.memory_space<vmem>>, vector<128x128xbf16>
      %cst_15 = arith.constant dense<0.000000e+00> : vector<16x128xf32>
      %32 = tpu.matmul %30, %31, %cst_15 {dimension_numbers = #tpu.dot_dimension_numbers<[1], [0], [0], [1], [0, 0, 1, 1], [], []>} : vector<16x128xbf16>, vector<128x128xbf16>, vector<16x128xf32> -> vector<16x128xf32>
      %33 = arith.truncf %32 : vector<16x128xf32> to vector<16x128xbf16>
      %34 = arith.index_cast %1 : i32 to index
      %c0_16 = arith.constant 0 : index
      %35 = vector.load %arg16[%34, %c0_16] : memref<64x128xbf16, #tpu.memory_space<vmem>>, vector<16x128xbf16>
      tpu.vector_store %arg16[%34, %c0_16], %33 {strides = array<i32>} : memref<64x128xbf16, #tpu.memory_space<vmem>>, vector<16x128xbf16>,
    } else {
    }
    %c2_i32 = arith.constant 2 : i32
    %13 = arith.cmpi eq, %arg0, %c2_i32 : i32
    %14 = arith.extui %13 : i1 to i32
    %c0_i32_5 = arith.constant 0 : i32
    %15 = arith.cmpi ne, %14, %c0_i32_5 : i32
    scf.if %15 {
      %21 = arith.index_cast %1 : i32 to index
      %c0 = arith.constant 0 : index
      %22 = vector.load %arg2[%21, %c0] : memref<64x64xbf16, #tpu.memory_space<vmem>>, vector<16x64xbf16>
      %c0_8 = arith.constant 0 : index
      %c0_9 = arith.constant 0 : index
      %23 = vector.load %arg16[%c0_8, %c0_9] : memref<64x128xbf16, #tpu.memory_space<vmem>>, vector<64x128xbf16>
      %cst = arith.constant dense<0.000000e+00> : vector<16x128xf32>
      %24 = tpu.matmul %22, %23, %cst {dimension_numbers = #tpu.dot_dimension_numbers<[1], [0], [0], [1], [0, 0, 1, 1], [], []>} : vector<16x64xbf16>, vector<64x128xbf16>, vector<16x128xf32> -> vector<16x128xf32>
      %c0_10 = arith.constant 0 : index
      %c0_11 = arith.constant 0 : index
      %25 = vector.load %arg9[%c0_10, %c0_11] : memref<1x128xf32, #tpu.memory_space<vmem>>, vector<1x128xf32>
      %26 = vector.broadcast %25 : vector<1x128xf32> to vector<16x128xf32>
      %27 = arith.addf %24, %26 : vector<16x128xf32>
      %cst_12 = arith.constant 0.000000e+00 : f32
      %28 = vector.broadcast %cst_12 : f32 to vector<16x128xf32>
      %29 = arith.maximumf %27, %28 : vector<16x128xf32>
      %30 = arith.truncf %29 : vector<16x128xf32> to vector<16x128xbf16>
      %31 = arith.index_cast %1 : i32 to index
      %c0_13 = arith.constant 0 : index
      %32 = vector.load %arg18[%31, %c0_13] : memref<64x128xbf16, #tpu.memory_space<vmem>>, vector<16x128xbf16>
      tpu.vector_store %arg18[%31, %c0_13], %30 {strides = array<i32>} : memref<64x128xbf16, #tpu.memory_space<vmem>>, vector<16x128xbf16>,
    } else {
    }
    %c2_i32_6 = arith.constant 2 : i32
    %16 = arith.cmpi eq, %arg0, %c2_i32_6 : i32
    %c3_i32 = arith.constant 3 : i32
    %17 = arith.cmpi eq, %arg1, %c3_i32 : i32
    %18 = arith.andi %16, %17 : i1
    %19 = arith.extui %18 : i1 to i32
    %c0_i32_7 = arith.constant 0 : i32
    %20 = arith.cmpi ne, %19, %c0_i32_7 : i32
    scf.if %20 {
      %c0 = arith.constant 0 : index
      %c0_8 = arith.constant 0 : index
      %21 = vector.load %arg10[%c0, %c0_8] : memref<2x64xbf16, #tpu.memory_space<vmem>>, vector<2x64xbf16>
      %c0_9 = arith.constant 0 : index
      %c0_10 = arith.constant 0 : index
      %22 = vector.load %arg18[%c0_9, %c0_10] : memref<64x128xbf16, #tpu.memory_space<vmem>>, vector<64x128xbf16>
      %cst = arith.constant dense<0.000000e+00> : vector<2x128xf32>
      %23 = tpu.matmul %21, %22, %cst {dimension_numbers = #tpu.dot_dimension_numbers<[1], [0], [0], [1], [0, 0, 1, 1], [], []>} : vector<2x64xbf16>, vector<64x128xbf16>, vector<2x128xf32> -> vector<2x128xf32>
      %c0_11 = arith.constant 0 : index
      %c0_12 = arith.constant 0 : index
      %24 = vector.load %arg11[%c0_11, %c0_12] : memref<128x64xf32, #tpu.memory_space<vmem>>, vector<128x64xf32>
      %cst_13 = arith.constant dense<0.000000e+00> : vector<2x64xf32>
      %25 = tpu.matmul %23, %24, %cst_13 {dimension_numbers = #tpu.dot_dimension_numbers<[1], [0], [0], [1], [0, 0, 1, 1], [], []>} : vector<2x128xf32>, vector<128x64xf32>, vector<2x64xf32> -> vector<2x64xf32>
      %c0_14 = arith.constant 0 : index
      %c0_15 = arith.constant 0 : index
      %26 = vector.load %arg12[%c0_14, %c0_15] : memref<1x64xf32, #tpu.memory_space<vmem>>, vector<1x64xf32>
      %27 = vector.broadcast %26 : vector<1x64xf32> to vector<2x64xf32>
      %28 = arith.addf %25, %27 : vector<2x64xf32>
      %cst_16 = arith.constant 0.000000e+00 : f32
      %29 = vector.broadcast %cst_16 : f32 to vector<2x64xf32>
      %30 = arith.maximumf %28, %29 : vector<2x64xf32>
      %c0_17 = arith.constant 0 : index
      %c0_18 = arith.constant 0 : index
      %31 = vector.load %arg13[%c0_17, %c0_18] : memref<64x128xf32, #tpu.memory_space<vmem>>, vector<64x128xf32>
      %cst_19 = arith.constant dense<0.000000e+00> : vector<2x128xf32>
      %32 = tpu.matmul %30, %31, %cst_19 {dimension_numbers = #tpu.dot_dimension_numbers<[1], [0], [0], [1], [0, 0, 1, 1], [], []>} : vector<2x64xf32>, vector<64x128xf32>, vector<2x128xf32> -> vector<2x128xf32>
      %c0_20 = arith.constant 0 : index
      %c0_21 = arith.constant 0 : index
      %33 = vector.load %arg14[%c0_20, %c0_21] : memref<1x128xf32, #tpu.memory_space<vmem>>, vector<1x128xf32>
      %34 = vector.broadcast %33 : vector<1x128xf32> to vector<2x128xf32>
      %35 = arith.addf %32, %34 : vector<2x128xf32>
      %c0_22 = arith.constant 0 : index
      %c0_23 = arith.constant 0 : index
      %36 = vector.load %arg15[%c0_22, %c0_23] : memref<2x128xf32, #tpu.memory_space<vmem>>, vector<2x128xf32>
      tpu.vector_store %arg15[%c0_22, %c0_23], %35 {strides = array<i32>} : memref<2x128xf32, #tpu.memory_space<vmem>>, vector<2x128xf32>,
    } else {
    }
    return
  }
  func.func @transform_0(%arg0: i32, %arg1: i32) -> (i32, i32) {
    %c0_i32 = arith.constant 0 : i32
    %c0_i32_0 = arith.constant 0 : i32
    %c0_i32_1 = arith.constant 0 : i32
    return %c0_i32, %c0_i32_0 : i32, i32
  }
  func.func @transform_1(%arg0: i32, %arg1: i32) -> (i32, i32) {
    %c0_i32 = arith.constant 0 : i32
    %c0_i32_0 = arith.constant 0 : i32
    %c0_i32_1 = arith.constant 0 : i32
    return %c0_i32, %c0_i32_0 : i32, i32
  }
  func.func @transform_2(%arg0: i32, %arg1: i32) -> (i32, i32) {
    %c0_i32 = arith.constant 0 : i32
    %c0_i32_0 = arith.constant 0 : i32
    %c0_i32_1 = arith.constant 0 : i32
    return %c0_i32, %c0_i32_0 : i32, i32
  }
  func.func @transform_3(%arg0: i32, %arg1: i32) -> (i32, i32) {
    %c0_i32 = arith.constant 0 : i32
    %c0_i32_0 = arith.constant 0 : i32
    %c0_i32_1 = arith.constant 0 : i32
    return %c0_i32, %c0_i32_0 : i32, i32
  }
  func.func @transform_4(%arg0: i32, %arg1: i32) -> (i32, i32) {
    %c0_i32 = arith.constant 0 : i32
    %c0_i32_0 = arith.constant 0 : i32
    %c0_i32_1 = arith.constant 0 : i32
    return %c0_i32, %c0_i32_0 : i32, i32
  }
  func.func @transform_5(%arg0: i32, %arg1: i32) -> (i32, i32) {
    %c0_i32 = arith.constant 0 : i32
    %c0_i32_0 = arith.constant 0 : i32
    %c0_i32_1 = arith.constant 0 : i32
    return %c0_i32, %c0_i32_0 : i32, i32
  }
  func.func @transform_6(%arg0: i32, %arg1: i32) -> (i32, i32) {
    %c0_i32 = arith.constant 0 : i32
    %c0_i32_0 = arith.constant 0 : i32
    %c0_i32_1 = arith.constant 0 : i32
    return %c0_i32, %c0_i32_0 : i32, i32
  }
  func.func @transform_7(%arg0: i32, %arg1: i32) -> (i32, i32) {
    %c0_i32 = arith.constant 0 : i32
    %c0_i32_0 = arith.constant 0 : i32
    %c0_i32_1 = arith.constant 0 : i32
    return %c0_i32, %c0_i32_0 : i32, i32
  }
  func.func @transform_8(%arg0: i32, %arg1: i32) -> (i32, i32) {
    %c0_i32 = arith.constant 0 : i32
    %c0_i32_0 = arith.constant 0 : i32
    %c0_i32_1 = arith.constant 0 : i32
    return %c0_i32, %c0_i32_0 : i32, i32
  }
  func.func @transform_9(%arg0: i32, %arg1: i32) -> (i32, i32) {
    %c0_i32 = arith.constant 0 : i32
    %c0_i32_0 = arith.constant 0 : i32
    %c0_i32_1 = arith.constant 0 : i32
    return %c0_i32, %c0_i32_0 : i32, i32
  }
  func.func @transform_10(%arg0: i32, %arg1: i32) -> (i32, i32) {
    %c0_i32 = arith.constant 0 : i32
    %c0_i32_0 = arith.constant 0 : i32
    %c0_i32_1 = arith.constant 0 : i32
    return %c0_i32, %c0_i32_0 : i32, i32
  }
  func.func @transform_11(%arg0: i32, %arg1: i32) -> (i32, i32) {
    %c0_i32 = arith.constant 0 : i32
    %c0_i32_0 = arith.constant 0 : i32
    %c0_i32_1 = arith.constant 0 : i32
    return %c0_i32, %c0_i32_0 : i32, i32
  }
  func.func @transform_12(%arg0: i32, %arg1: i32) -> (i32, i32) {
    %c0_i32 = arith.constant 0 : i32
    %c0_i32_0 = arith.constant 0 : i32
    %c0_i32_1 = arith.constant 0 : i32
    return %c0_i32, %c0_i32_0 : i32, i32
  }
  func.func @transform_13(%arg0: i32, %arg1: i32) -> (i32, i32) {
    %c0_i32 = arith.constant 0 : i32
    %c0_i32_0 = arith.constant 0 : i32
    %c0_i32_1 = arith.constant 0 : i32
    return %c0_i32, %c0_i32_0 : i32, i32
  }
}

</mosaic_0001>

<bundles_post_ra>
// kernel: tpu_custom_call.1
= control target key start
LH: loop header
LB: loop body
LE: loop exit
PB: predicated region body
PF: predicated region fallthrough
CT: control target
= control target key end

     0   :  { %s2380_s0 = inlined_call_operand.hbm [shape: bf16[64,64], index: 0, kind: input, shape index: {}]   ;;  %s2381_s1 = inlined_call_operand.vmem [shape: bf16[64,32], index: 1, kind: input, shape index: {}]   ;;  %s2382_s2 = inlined_call_operand.vmem [shape: bf16[32,128], index: 2, kind: input, shape index: {}]   ;;  %s2383_s3 = inlined_call_operand.vmem [shape: f32[1,128], index: 3, kind: input, shape index: {}]   ;;  %s2384_s4 = inlined_call_operand.vmem [shape: bf16[128,128], index: 4, kind: input, shape index: {}]   ;;  %s2385_s5 = inlined_call_operand.vmem [shape: f32[1,128], index: 5, kind: input, shape index: {}]   ;;  %s2386_s6 = inlined_call_operand.vmem [shape: bf16[128,128], index: 6, kind: input, shape index: {}]   ;;  %s2387_s7 = inlined_call_operand.hbm [shape: f32[1,128], index: 7, kind: input, shape index: {}]   ;;  %s2388_s8 = inlined_call_operand.hbm [shape: bf16[2,64], index: 8, kind: input, shape index: {}]   ;;  %s2389_s9 = inlined_call_operand.vmem [shape: f32[128,64], index: 9, kind: input, shape index: {}]   ;;  %s2390_s10 = inlined_call_operand.vmem [shape: f32[1,64], index: 10, kind: input, shape index: {}]   ;;  %s2391_s11 = inlined_call_operand.vmem [shape: f32[64,128], index: 11, kind: input, shape index: {}]   ;;  %s2392_s12 = inlined_call_operand.vmem [shape: f32[1,128], index: 12, kind: input, shape index: {}]   ;;  %s2393_s13 = inlined_call_operand.hbm [shape: f32[2,128], index: 13, kind: output, shape index: {}]  }
   0x1   :  { %2403 = sst [smem:[#allocation20_spill]] %s2387_s7 }
   0x2   :  { %2404 = sst [smem:[#allocation21_spill]] %s2392_s12 }
   0x3   :  { %2405 = sst [smem:[#allocation22_spill]] %s2393_s13 }
   0x4   :  { %18 = vsyncpa [#allocation6], 0 }
   0x5   :  { %19 = vsyncpa [#allocation9], 0 }
   0x6   :  { %20 = vsyncpa [#allocation7], 0  ;;  %s2025_s25 = smov 0   ;;  %s2027_s26 = smov 0  }
   0x7   :  { %s2029_s27 = smov 0   ;;  %s2031_s28 = smov 0  }
   0x8   :  { %s2033_s29 = smov 0  }
   0x9 LB: > { %2406 = sst [smem:[#allocation15_spill]] %s1924_s27  ;;  %s1938_s30 = smov [#allocation8]   ;;  %s1932_s29 = sphi %s2033_s29, %s26_s29   ;;  %s1928_s28 = sphi %s2031_s28, %s2429_s28   ;;  %s1924_s27 = sphi %s2029_s27, %s2428_s27   ;;  %s1920_s26 = sphi %s2027_s26, %s2427_s26   ;;  %s1916_s25 = sphi %s2025_s25, %s2426_s25  }
   0xa   : > { %2407 = sst [smem:[#allocation16_spill]] %s1928_s28  ;;  %s381_s14 = sshll.u32 %s1938_s30, 4  ;;  %s382_s14 = int_to_ptr.vmem [resolvable:$true] %s381_s14 }
   0xb   : > { %2408 = sst [smem:[#allocation17_spill]] %s1932_s29  ;;  %s2394_s15 = sadd.s32 4294967295, %s1932_s29  }
   0xc   : > { %p1336_p0 = scmp.ge.s32.totalorder %s1932_s29, 1  ;;  %p337_p1 = scmp.lt.s32.totalorder %s1932_s29, 13 }
   0xd   : > { %p2055_p2 = scmp.eq.s32.totalorder %s2394_s15, 0  ;;  %s35_s19 = sadd.s32 1, %s1924_s27 }
   0xe   : > { %p2059_p3 = pnand %p1336_p0, %p337_p1  ;;  %p2072_p6 = scmp.ge.s32.totalorder %s35_s19, 4 }
   0xf   : > { %s2409_s16 = scalar_select %p2055_p2, 1, 0 }
  0x10   : > { %s2410_s17 = scalar_select %p2059_p3, 1, 0 }
  0x11   : > { %p1663_p4 = pneg %p2059_p3  ;;  %s2413_s7 = sld [smem:[#allocation20_spill]] }
  0x12   : > { %s2412_s20 = scalar_select %p2072_p6, 1, 0 }
  0x13   : > { %p2067_p5 = pnand %p2055_p2, %p1663_p4 }
  0x15   : > { %p2084_p8 = pneg %p2067_p5 }
  0x17   : > { %s1768_s23 = scalar_lea.hbm %s2413_s7, 16 }
  0x18   : > { %p1769_p7 = scmp.ne.s32.totalorder %s2413_s7, %s1768_s23  ;;  %p1775_p11 = scmp.lt.u32.totalorder %s1768_s23, %s2413_s7 }
  0x1a   : > { %p1771_p9 = pnand %p2084_p8, %p1769_p7 }
  0x1c   : > { %p1772_p10 = pneg %p1771_p9 }
  0x1e   : > { %p1777_p12 = pnand %p1775_p11, %p1772_p10 }
  0x20   : > { %1780 = shalt.err (!%p1777_p12)
}
  0x21   : > { %s1781_s21 = scalar_lea.vmem %s382_s14, 16  ;;  %s1788_s22 = scalar_lea.vmem %s382_s14, 32 }
  0x22   : > { %p1782_p13 = scmp.ne.s32.totalorder %s382_s14, %s1781_s21  ;;  %p1789_p4 = scmp.lt.s32.totalorder %s382_s14, %s382_s14 }
  0x23   : > { %p1790_p2 = scmp.lt.s32.totalorder %s1788_s22, %s1781_s21 }
  0x24   : > { %p1784_p0 = pnand %p1782_p13, %p2084_p8 }
  0x25   : > { %p1791_p3 = por %p1790_p2, %p1789_p4 }
  0x26   : > { %p1785_p1 = pneg %p1784_p0 }
  0x28   : > { %p1792_p6 = pnand %p1791_p3, %p1785_p1 }
  0x2a   : > { %1795 = shalt.err (!%p1792_p6)
}
  0x2b   : > { %1669 = dma.hbm_to_vmem [thread:$0]  (!%p2067_p5), %s2413_s7, 16, %s382_s14, [#allocation9]  }
  0x2c   : > { %p2415_p7 = scmp.ne.s32.totalorder %s2412_s20, 0  ;;  %s38_s13 = sadd.s32 1, %s1928_s28 }
  0x2d   : > { %s1939_s27 = smov [#allocation5]   ;;  %s1796_s24 = scalar_lea.hbm %s2380_s0, 512 }
  0x2e   : > { %s2431_s19 = smov (%p2415_p7, %s35_s19), 0  ;;  %s2433_s13 = smov (!%p2415_p7, %s38_s13), %s1928_s28 }
  0x2f   : > { %2416 = sst [smem:[#allocation18_spill]] %s2431_s19  ;;  %s349_s23 = sshll.u32 %s1939_s27, 4  ;;  %s350_s23 = int_to_ptr.vmem [resolvable:$true] %s349_s23 }
  0x30   : > { %p40_p2 = scmp.ge.s32.totalorder %s2433_s13, 3  ;;  %p1797_p3 = scmp.ne.s32.totalorder %s2380_s0, %s1796_s24 }
  0x31   : > { %p1803_p10 = scmp.lt.u32.totalorder %s1796_s24, %s2380_s0 }
  0x32   : > { %s2435_s13 = smov (%p40_p2, %s2433_s13), 0  ;;  %p1799_p6 = pnand %p1797_p3, %p2084_p8 }
  0x33   : > { %2417 = sst [smem:[#allocation19_spill]] %s2435_s13 }
  0x34   : > { %p1800_p9 = pneg %p1799_p6 }
  0x36   : > { %p1805_p11 = pnand %p1803_p10, %p1800_p9 }
  0x38   : > { %1808 = shalt.err (!%p1805_p11)
}
  0x39   : > { %s1809_s27 = scalar_lea.vmem %s350_s23, 512  ;;  %p1817_p1 = scmp.lt.s32.totalorder %s350_s23, %s350_s23 }
  0x3a   : > { %p1810_p12 = scmp.ne.s32.totalorder %s350_s23, %s1809_s27  ;;  %p1818_p4 = scmp.lt.s32.totalorder %s1809_s27, %s1809_s27 }
  0x3c   : > { %p1812_p13 = pnand %p1810_p12, %p2084_p8  ;;  %p1819_p7 = por %p1818_p4, %p1817_p1 }
  0x3e   : > { %p1813_p0 = pneg %p1812_p13 }
  0x40   : > { %p1820_p2 = pnand %p1819_p7, %p1813_p0 }
  0x42   : > { %1823 = shalt.err (!%p1820_p2)
}
  0x43   : > { %s1940_s29 = smov 64   ;;  %s1941_s21 = smov 4  }
  0x44   : > { %1666 = dma.hbm_to_vmem [thread:$0]  (!%p2067_p5), %s2380_s0, 512, %s350_s23, [#allocation6], %s1940_s29, %s1940_s29, %s1941_s21  }
  0x45   : > { %s1942_s30 = smov [#allocation10]   ;;  %s1824_s13 = scalar_lea.hbm %s2388_s8, 16 }
  0x46   : > { %s392_s14 = sshll.u32 %s1942_s30, 4  ;;  %p1825_p3 = scmp.ne.s32.totalorder %s2388_s8, %s1824_s13  ;;  %s393_s14 = int_to_ptr.vmem [resolvable:$true] %s392_s14 }
  0x47   : > { %p1831_p10 = scmp.lt.u32.totalorder %s1824_s13, %s2388_s8 }
  0x48   : > { %p1827_p6 = pnand %p1825_p3, %p2084_p8 }
  0x4a   : > { %p1828_p9 = pneg %p1827_p6 }
  0x4c   : > { %p1833_p11 = pnand %p1831_p10, %p1828_p9 }
  0x4e   : > { %1836 = shalt.err (!%p1833_p11)
}
  0x4f   : > { %s1837_s23 = scalar_lea.vmem %s393_s14, 16  ;;  %s1844_s7 = scalar_lea.vmem %s393_s14, 32 }
  0x50   : > { %p1838_p12 = scmp.ne.s32.totalorder %s393_s14, %s1837_s23  ;;  %p1845_p1 = scmp.lt.s32.totalorder %s393_s14, %s393_s14 }
  0x51   : > { %p1846_p4 = scmp.lt.s32.totalorder %s1844_s7, %s1837_s23 }
  0x52   : > { %p1840_p13 = pnand %p1838_p12, %p2084_p8 }
  0x53   : > { %p1847_p7 = por %p1846_p4, %p1845_p1 }
  0x54   : > { %p1841_p0 = pneg %p1840_p13 }
  0x56   : > { %p1848_p2 = pnand %p1847_p7, %p1841_p0 }
  0x58   : > { %1851 = shalt.err (!%p1848_p2)
}
  0x59   : > { %1672 = dma.hbm_to_vmem [thread:$0]  (!%p2067_p5), %s2388_s8, 16, %s393_s14, [#allocation9]  }
  0x5a   : > { %p2418_p3 = scmp.ne.s32.totalorder %s2410_s17, 0 }
  0x5b   : > { %p2419_p6 = scmp.ne.s32.totalorder (!%p2418_p3), %s2409_s16, 0 }
  0x5c   : > { %417 = sbr.rel (%p2418_p3) target bundleno = 2201 (0x899), region = 72 }
  0x63   : > { %1903 = dma.done.wait (%p2419_p6), [#allocation6], 512  }
  0x64   : > { %1905 = vsyncadd (%p2419_p6), [#allocation6], 4294966784 }
  0x65   : > { %1907 = dma.done.wait (%p2419_p6), [#allocation9], 32  }
  0x66   : > { %1909 = vsyncadd (%p2419_p6), [#allocation9], 4294967264  ;;  %s2157_s12 = sshll.u32 %s1916_s25, 4  ;;  %p461_p5 = scmp.eq.s32.totalorder %s1920_s26, 0 }
  0x67   : > { %p462_p8 = scmp.eq.s32.totalorder %s1916_s25, 0 }
  0x69   : > { %p463_p9 = pnand %p462_p8, %p461_p5 }
  0x6a   : > { %s2161_s28 = smov (!%p463_p9), 0  }
  0x6b   : > { %466 = sbr.rel (%p463_p9) target bundleno = 340 (0x154), region = 88 }
  0x72 LB: >> { %v1746_v0 = vld [vmem:[%s2382_s2] sm:$0xff]   ;;  %v1943_v1 = vmov 0.0   ;;  %v1747_v2 = vld [vmem:[%s2382_s2 + $0x8] sm:$0xff]   ;;  %vm1944_vm0 = vmmov 0   ;;  %s1345_s13 = sshll.u32 %s1936_s28, 4  ;;  %vm501_vm1 = vcmask 261120   ;;  %s1936_s28 = sphi %s2161_s28, %s472_s28  }
  0x73   : >> { %1461 = vmatprep.subr.bf16.mxu0 %v1943_v1  ;;  %1465 = vmatprep.mubr.msk.bf16.mxu0 %vm1944_vm0, %v1943_v1  ;;  %s474_s21 = sshra.s32 %s1345_s13, 3  ;;  %s547_s20 = sshra.s32 %s1345_s13, 4 }
  0x74   : >> { %1462 = vmatpush3.bf16.msra.mxu0 %v1746_v0  ;;  %s1346_s22 = sshll.u32 %s474_s21, 2  ;;  %s1351_s27 = sshll.u32 %s547_s20, 3 }
  0x75   : >> { %1463 = vmatprep.subr.bf16.mxu0 %v1943_v1  ;;  %s477_s14 = scalar_lea.vmem %s2381_s1, %s1346_s22  ;;  %s550_s23 = scalar_lea.vmem [#allocation2], %s1351_s27 }
  0x76   : >> { %v1748_v3 = vld [vmem:[%s477_s14] sm:$0xff]   ;;  %s472_s28 = sadd.s32 1, %s1936_s28  }
  0x77   : >> { %p469_p10 = scmp.ge.s32.totalorder %s472_s28, 4  }
  0x78   : >> { %1464 = vmatpush3.bf16.msra.mxu0 %v1747_v2 }
  0x7b   : >> { %1466 = vmatmul.mubr.msk.bf16.vlgmr.msra.gmra.mrb[0].mxu0 %vm501_vm1, %v1748_v3 }
 0x14d   : > { %471 = sbr.rel (!%p469_p10) target bundleno = 114 (0x72), region = 144 }
 0x14e   : >> { %v539_v4 = vpop.f32.mrb[0].mxu0 }
 0x14f   : >> { %v1467_v5 = vpop.f32.mrb[1].mxu0 }
 0x150   : >> { %v542_v6 = vpop.f32.mrb[2].mxu0 }
 0x151   : >> { %v546_v7 = vpack.c.bf16 %v542_v6, %v539_v4  ;;  %v1468_v8 = vpop.f32.mrb[3].mxu0 }
 0x153   : >> { %551 = vst [vmem:[%s550_s23] sm:$0xff] %v546_v7 }
 0x154 PF: > { %p1352_p11 = scmp.ne.s32.totalorder %s1920_s26, 0 }
 0x155   : > { %s555_s7 = sshra.s32 (!%p1352_p11), %s2157_s12, 3  ;;  %v1945_v10 = vmov (!%p1352_p11), 0.0   ;;  %vm1946_vm2 = vmmov (!%p1352_p11), 0   ;;  %v1750_v11 = vld [vmem:[%s2384_s4] sm:$0xff] (!%p1352_p11)   ;;  %v1751_v13 = vld [vmem:[%s2384_s4 + $0x8] sm:$0xff] (!%p1352_p11)   ;;  %v1752_v15 = vld [vmem:[%s2384_s4 + $0x10] sm:$0xff] (!%p1352_p11)  }
 0x156   : > { %554 = sbr.rel (%p1352_p11) target bundleno = 799 (0x31f), region = 99  ;;  %1469 = vmatprep.subr.bf16.mxu0 (!%p1352_p11), %v1945_v10  ;;  %1477 = vmatprep.mubr.msk.bf16.mxu0 (!%p1352_p11), %vm1946_vm2, %v1945_v10  ;;  %s1353_s19 = sshll.u32 (!%p1352_p11), %s555_s7, 2  ;;  %v1753_v17 = vld [vmem:[%s2384_s4 + $0x18] sm:$0xff] (!%p1352_p11)   ;;  %vm577_vm3 = vcmask (!%p1352_p11), 523264   ;;  %v1754_v19 = vld [vmem:[%s2384_s4 + $0x20] sm:$0xff] (!%p1352_p11)   ;;  %v1755_v20 = vld [vmem:[%s2384_s4 + $0x28] sm:$0xff] (!%p1352_p11)  }
 0x157   : > { %1481 = vmatprep.subr.bf16.mxu1 (!%p1352_p11), %v1945_v10  ;;  %s558_s28 = scalar_lea.vmem (!%p1352_p11), [#allocation5], %s1353_s19  ;;  %1497 = vmatprep.mubr.msk.bf16.mxu1 (!%p1352_p11), %vm1946_vm2, %v1945_v10  ;;  %v1756_v21 = vld [vmem:[%s2384_s4 + $0x30] sm:$0xff] (!%p1352_p11)   ;;  %v1757_v22 = vld [vmem:[%s2384_s4 + $0x38] sm:$0xff] (!%p1352_p11)   ;;  %v1354_v23 = vld [vmem:[%s2383_s3] ss:$0 sm:$0xff] (!%p1352_p11) }
 0x158   : > { %1482 = vmatpush3.bf16.msra.mxu1 (!%p1352_p11), %v1750_v11  ;;  %v1749_v18 = vld [vmem:[%s558_s28] sm:$0xff] (!%p1352_p11)   ;;  %s731_s28 = sshra.s32 (!%p1352_p11), %s2157_s12, 4 }
 0x159   : > { %1483 = vmatprep.subr.bf16.mxu1 (!%p1352_p11), %v1945_v10  ;;  %s1365_s17 = sshll.u32 (!%p1352_p11), %s731_s28, 3 }
 0x15a   : > { %v561_v9 = vld [vmem:[#allocation2] sm:$0xff] (!%p1352_p11)  ;;  %v562_v12 = vld [vmem:[#allocation2 + $0x8] sm:$0xff] (!%p1352_p11)  ;;  %v563_v14 = vld [vmem:[#allocation2 + $0x10] sm:$0xff] (!%p1352_p11)  ;;  %s734_s16 = scalar_lea.vmem (!%p1352_p11), [#allocation3], %s1365_s17 }
 0x15b   : > { %1470 = vmatpush3.bf16.msra.mxu0 (!%p1352_p11), %v561_v9  ;;  %v564_v16 = vld [vmem:[#allocation2 + $0x18] sm:$0xff] (!%p1352_p11) }
 0x15c   : > { %1471 = vmatprep.subr.bf16.mxu0 (!%p1352_p11), %v1945_v10  ;;  %1484 = vmatpush3.bf16.msra.mxu1 (!%p1352_p11), %v1751_v13 }
 0x15d   : > { %1485 = vmatprep.subr.bf16.mxu1 %v1945_v10 }
 0x15f   : > { %1472 = vmatpush3.bf16.msra.mxu0 %v562_v12 }
 0x160   : > { %1473 = vmatprep.subr.bf16.mxu0 %v1945_v10  ;;  %1486 = vmatpush3.bf16.msra.mxu1 %v1752_v15 }
 0x161   : > { %1487 = vmatprep.subr.bf16.mxu1 %v1945_v10 }
 0x163   : > { %1474 = vmatpush3.bf16.msra.mxu0 %v563_v14 }
 0x164   : > { %1475 = vmatprep.subr.bf16.mxu0 %v1945_v10  ;;  %1488 = vmatpush3.bf16.msra.mxu1 %v1753_v17 }
 0x165   : > { %1489 = vmatprep.subr.bf16.mxu1 %v1945_v10 }
 0x167   : > { %1476 = vmatpush3.bf16.msra.mxu0 %v564_v16 }
 0x168   : > { %1490 = vmatpush3.bf16.msra.mxu1 %v1754_v19 }
 0x169   : > { %1491 = vmatprep.subr.bf16.mxu1 %v1945_v10 }
 0x16a   : > { %1478 = vmatmul.mubr.msk.bf16.vlgmr.msra.gmra.mrb[0].mxu0 %vm577_vm3, %v1749_v18 }
 0x16c   : > { %1492 = vmatpush3.bf16.msra.mxu1 %v1755_v20 }
 0x16d   : > { %1493 = vmatprep.subr.bf16.mxu1 %v1945_v10 }
 0x170   : > { %1494 = vmatpush3.bf16.msra.mxu1 %v1756_v21 }
 0x171   : > { %1495 = vmatprep.subr.bf16.mxu1 %v1945_v10 }
 0x174   : > { %1496 = vmatpush3.bf16.msra.mxu1 %v1757_v22 }
 0x23d   : > { %v615_v24 = vpop.f32.mrb[0].mxu0 }
 0x23e   : > { %v616_v25 = vadd.f32 %v1354_v23, %v615_v24  ;;  %v1479_v26 = vpop.f32.mrb[1].mxu0 }
 0x23f   : > { %v618_v27 = vpop.f32.mrb[2].mxu0 }
 0x240   : > { %v619_v28 = vadd.f32 %v1354_v23, %v618_v27  ;;  %v1480_v29 = vpop.f32.mrb[3].mxu0  ;;  %v622_v30 = vmax.f32 %v616_v25, 0.0 }
 0x242   : > { %v623_v31 = vmax.f32 %v619_v28, 0.0 }
 0x244   : > { %v624_v32 = vpack.c.bf16 %v623_v31, %v622_v30 }
 0x246   : > { %1498 = vmatmul.mubr.bf16.vlgmr.msra.gmra.mrb[0].mxu1 %v624_v32 }
 0x319   : > { %v723_v33 = vpop.f32.mrb[0].mxu1 }
 0x31a   : > { %v1499_v34 = vpop.f32.mrb[1].mxu1 }
 0x31b   : > { %v726_v35 = vpop.f32.mrb[2].mxu1 }
 0x31c   : > { %v730_v36 = vpack.c.bf16 %v726_v35, %v723_v33  ;;  %v1500_v37 = vpop.f32.mrb[3].mxu1 }
 0x31e   : > { %735 = vst [vmem:[%s734_s16] sm:$0xff] %v730_v36 }
 0x31f PF: > { %p1366_p12 = scmp.ne.s32.totalorder %s1920_s26, 1 }
 0x320   : > { %s740_s18 = sshra.s32 (!%p1366_p12), %s2157_s12, 3  ;;  %v1947_v39 = vmov (!%p1366_p12), 0.0   ;;  %vm1948_vm4 = vmmov (!%p1366_p12), 0   ;;  %v1759_v40 = vld [vmem:[%s2386_s6] sm:$0xff] (!%p1366_p12)   ;;  %v1760_v42 = vld [vmem:[%s2386_s6 + $0x8] sm:$0xff] (!%p1366_p12)   ;;  %v1761_v44 = vld [vmem:[%s2386_s6 + $0x10] sm:$0xff] (!%p1366_p12)  }
 0x321   : > { %739 = sbr.rel (%p1366_p12) target bundleno = 1258 (0x4ea), region = 103  ;;  %1501 = vmatprep.subr.bf16.mxu0 (!%p1366_p12), %v1947_v39  ;;  %1509 = vmatprep.mubr.msk.bf16.mxu0 (!%p1366_p12), %vm1948_vm4, %v1947_v39  ;;  %s1367_s13 = sshll.u32 (!%p1366_p12), %s740_s18, 2  ;;  %v1762_v46 = vld [vmem:[%s2386_s6 + $0x18] sm:$0xff] (!%p1366_p12)   ;;  %vm762_vm5 = vcmask (!%p1366_p12), 523264   ;;  %v1763_v48 = vld [vmem:[%s2386_s6 + $0x20] sm:$0xff] (!%p1366_p12)   ;;  %v1764_v49 = vld [vmem:[%s2386_s6 + $0x28] sm:$0xff] (!%p1366_p12)  }
 0x322   : > { %1513 = vmatprep.subr.bf16.mxu1 (!%p1366_p12), %v1947_v39  ;;  %s743_s24 = scalar_lea.vmem (!%p1366_p12), [#allocation5], %s1367_s13  ;;  %1529 = vmatprep.mubr.msk.bf16.mxu1 (!%p1366_p12), %vm1948_vm4, %v1947_v39  ;;  %v1765_v50 = vld [vmem:[%s2386_s6 + $0x30] sm:$0xff] (!%p1366_p12)   ;;  %v1766_v51 = vld [vmem:[%s2386_s6 + $0x38] sm:$0xff] (!%p1366_p12)   ;;  %v1368_v52 = vld [vmem:[%s2385_s5] ss:$0 sm:$0xff] (!%p1366_p12) }
 0x323   : > { %1514 = vmatpush3.bf16.msra.mxu1 (!%p1366_p12), %v1759_v40  ;;  %v1758_v47 = vld [vmem:[%s743_s24] sm:$0xff] (!%p1366_p12)   ;;  %s916_s24 = sshra.s32 (!%p1366_p12), %s2157_s12, 4 }
 0x324   : > { %1515 = vmatprep.subr.bf16.mxu1 (!%p1366_p12), %v1947_v39  ;;  %s1379_s30 = sshll.u32 (!%p1366_p12), %s916_s24, 3 }
 0x325   : > { %v746_v38 = vld [vmem:[#allocation3] sm:$0xff] (!%p1366_p12)  ;;  %v747_v41 = vld [vmem:[#allocation3 + $0x8] sm:$0xff] (!%p1366_p12)  ;;  %v748_v43 = vld [vmem:[#allocation3 + $0x10] sm:$0xff] (!%p1366_p12)  ;;  %s919_s14 = scalar_lea.vmem (!%p1366_p12), [#allocation2], %s1379_s30 }
 0x326   : > { %1502 = vmatpush3.bf16.msra.mxu0 (!%p1366_p12), %v746_v38  ;;  %v749_v45 = vld [vmem:[#allocation3 + $0x18] sm:$0xff] (!%p1366_p12) }
 0x327   : > { %1503 = vmatprep.subr.bf16.mxu0 (!%p1366_p12), %v1947_v39  ;;  %1516 = vmatpush3.bf16.msra.mxu1 (!%p1366_p12), %v1760_v42 }
 0x328   : > { %1517 = vmatprep.subr.bf16.mxu1 %v1947_v39 }
 0x32a   : > { %1504 = vmatpush3.bf16.msra.mxu0 %v747_v41 }
 0x32b   : > { %1505 = vmatprep.subr.bf16.mxu0 %v1947_v39  ;;  %1518 = vmatpush3.bf16.msra.mxu1 %v1761_v44 }
 0x32c   : > { %1519 = vmatprep.subr.bf16.mxu1 %v1947_v39 }
 0x32e   : > { %1506 = vmatpush3.bf16.msra.mxu0 %v748_v43 }
 0x32f   : > { %1507 = vmatprep.subr.bf16.mxu0 %v1947_v39  ;;  %1520 = vmatpush3.bf16.msra.mxu1 %v1762_v46 }
 0x330   : > { %1521 = vmatprep.subr.bf16.mxu1 %v1947_v39 }
 0x332   : > { %1508 = vmatpush3.bf16.msra.mxu0 %v749_v45 }
 0x333   : > { %1522 = vmatpush3.bf16.msra.mxu1 %v1763_v48 }
 0x334   : > { %1523 = vmatprep.subr.bf16.mxu1 %v1947_v39 }
 0x335   : > { %1510 = vmatmul.mubr.msk.bf16.vlgmr.msra.gmra.mrb[0].mxu0 %vm762_vm5, %v1758_v47 }
 0x337   : > { %1524 = vmatpush3.bf16.msra.mxu1 %v1764_v49 }
 0x338   : > { %1525 = vmatprep.subr.bf16.mxu1 %v1947_v39 }
 0x33b   : > { %1526 = vmatpush3.bf16.msra.mxu1 %v1765_v50 }
 0x33c   : > { %1527 = vmatprep.subr.bf16.mxu1 %v1947_v39 }
 0x33f   : > { %1528 = vmatpush3.bf16.msra.mxu1 %v1766_v51 }
 0x408   : > { %v800_v53 = vpop.f32.mrb[0].mxu0 }
 0x409   : > { %v801_v54 = vadd.f32 %v1368_v52, %v800_v53  ;;  %v1511_v55 = vpop.f32.mrb[1].mxu0 }
 0x40a   : > { %v803_v56 = vpop.f32.mrb[2].mxu0 }
 0x40b   : > { %v804_v57 = vadd.f32 %v1368_v52, %v803_v56  ;;  %v1512_v58 = vpop.f32.mrb[3].mxu0  ;;  %v807_v59 = vmax.f32 %v801_v54, 0.0 }
 0x40d   : > { %v808_v60 = vmax.f32 %v804_v57, 0.0 }
 0x40f   : > { %v809_v61 = vpack.c.bf16 %v808_v60, %v807_v59 }
 0x411   : > { %1530 = vmatmul.mubr.bf16.vlgmr.msra.gmra.mrb[0].mxu1 %v809_v61 }
 0x4e4   : > { %v908_v62 = vpop.f32.mrb[0].mxu1 }
 0x4e5   : > { %v1531_v63 = vpop.f32.mrb[1].mxu1 }
 0x4e6   : > { %v911_v0 = vpop.f32.mrb[2].mxu1 }
 0x4e7   : > { %v915_v1 = vpack.c.bf16 %v911_v0, %v908_v62  ;;  %v1532_v2 = vpop.f32.mrb[3].mxu1 }
 0x4e9   : > { %920 = vst [vmem:[%s919_s14] sm:$0xff] %v915_v1 }
 0x4ea PF: > { %p921_p13 = scmp.eq.s32.totalorder %s1920_s26, 2  ;;  %p1380_p0 = scmp.ne.s32.totalorder %s1920_s26, 2 }
 0x4eb   : > { %s925_s20 = sshra.s32 (!%p1380_p0), %s2157_s12, 3  ;;  %v1949_v4 = vmov (!%p1380_p0), 0.0   ;;  %vm1950_vm6 = vmmov (!%p1380_p0), 0   ;;  %vm947_vm7 = vcmask (!%p1380_p0), 523264   ;;  %v1382_v9 = vld [vmem:[#allocation8] ss:$0 sm:$0xff] (!%p1380_p0) }
 0x4ec   : > { %924 = sbr.rel (%p1380_p0) target bundleno = 1501 (0x5dd), region = 107  ;;  %1533 = vmatprep.subr.bf16.mxu0 (!%p1380_p0), %v1949_v4  ;;  %1541 = vmatprep.mubr.msk.bf16.mxu0 (!%p1380_p0), %vm1950_vm6, %v1949_v4  ;;  %s1381_s27 = sshll.u32 (!%p1380_p0), %s925_s20, 2 }
 0x4ed   : > { %s928_s23 = scalar_lea.vmem (!%p1380_p0), [#allocation5], %s1381_s27  ;;  %s995_s7 = sshra.s32 (!%p1380_p0), %s2157_s12, 4 }
 0x4ee   : > { %v1767_v8 = vld [vmem:[%s928_s23] sm:$0xff] (!%p1380_p0)   ;;  %s1385_s19 = sshll.u32 (!%p1380_p0), %s995_s7, 3 }
 0x4ef   : > { %s998_s29 = scalar_lea.vmem (!%p1380_p0), [#allocation4], %s1385_s19 }
 0x4f0   : > { %v931_v3 = vld [vmem:[#allocation2] sm:$0xff] (!%p1380_p0)  ;;  %v932_v5 = vld [vmem:[#allocation2 + $0x8] sm:$0xff] (!%p1380_p0)  ;;  %v933_v6 = vld [vmem:[#allocation2 + $0x10] sm:$0xff] (!%p1380_p0) }
 0x4f1   : > { %1534 = vmatpush3.bf16.msra.mxu0 (!%p1380_p0), %v931_v3  ;;  %v934_v7 = vld [vmem:[#allocation2 + $0x18] sm:$0xff] (!%p1380_p0) }
 0x4f2   : > { %1535 = vmatprep.subr.bf16.mxu0 (!%p1380_p0), %v1949_v4 }
 0x4f5   : > { %1536 = vmatpush3.bf16.msra.mxu0 %v932_v5 }
 0x4f6   : > { %1537 = vmatprep.subr.bf16.mxu0 %v1949_v4 }
 0x4f9   : > { %1538 = vmatpush3.bf16.msra.mxu0 %v933_v6 }
 0x4fa   : > { %1539 = vmatprep.subr.bf16.mxu0 %v1949_v4 }
 0x4fd   : > { %1540 = vmatpush3.bf16.msra.mxu0 %v934_v7 }
 0x500   : > { %1542 = vmatmul.mubr.msk.bf16.vlgmr.msra.gmra.mrb[0].mxu0 %vm947_vm7, %v1767_v8 }
 0x5d3   : > { %v985_v10 = vpop.f32.mrb[0].mxu0 }
 0x5d4   : > { %v986_v11 = vadd.f32 %v1382_v9, %v985_v10  ;;  %v1543_v12 = vpop.f32.mrb[1].mxu0 }
 0x5d5   : > { %v988_v13 = vpop.f32.mrb[2].mxu0 }
 0x5d6   : > { %v989_v14 = vadd.f32 %v1382_v9, %v988_v13  ;;  %v1544_v15 = vpop.f32.mrb[3].mxu0  ;;  %v992_v16 = vmax.f32 %v986_v11, 0.0 }
 0x5d8   : > { %v993_v17 = vmax.f32 %v989_v14, 0.0 }
 0x5da   : > { %v994_v18 = vpack.c.bf16 %v993_v17, %v992_v16 }
 0x5dc   : > { %999 = vst [vmem:[%s998_s29] sm:$0xff] %v994_v18 }
 0x5dd PF: > { %p1000_p1 = scmp.eq.s32.totalorder %s1916_s25, 3 }
 0x5df   : > { %p1001_p4 = pnand %p1000_p1, %p921_p13 }
 0x5e0   : > { %v1951_v20 = vmov (!%p1001_p4), 0.0   ;;  %vm1952_vm8 = vmmov (!%p1001_p4), 0   ;;  %v1054_v21 = vld [vmem:[%s2389_s9] sm:$0xff] (!%p1001_p4)  ;;  %v1953_v22 = vmov (!%p1001_p4), 0.0|0.0   ;;  %v1055_v23 = vld [vmem:[%s2389_s9 + $0x8] sm:$0xff] (!%p1001_p4)  ;;  %v1056_v24 = vld [vmem:[%s2389_s9 + $0x10] sm:$0xff] (!%p1001_p4) }
 0x5e1   : > { %1004 = sbr.rel (%p1001_p4) target bundleno = 2166 (0x876), region = 111  ;;  %1545 = vmatprep.subr.bf16.mxu0 (!%p1001_p4), %v1951_v20  ;;  %1553 = vmatprep.mubr.msk.bf16.mxu0 (!%p1001_p4), %vm1952_vm8, %v1951_v20  ;;  %v1057_v25 = vld [vmem:[%s2389_s9 + $0x18] sm:$0xff] (!%p1001_p4)  ;;  %v1612_v27 = vpack.c.bf16 (!%p1001_p4), %v1055_v23, %v1054_v21  ;;  %v1058_v29 = vld [vmem:[%s2389_s9 + $0x20] sm:$0xff] (!%p1001_p4)  ;;  %v1059_v30 = vld [vmem:[%s2389_s9 + $0x28] sm:$0xff] (!%p1001_p4)  ;;  %vm1010_vm9 = vcmask (!%p1001_p4), 523264   ;;  %s2420_s30 = sld [smem:[#allocation21_spill]] (!%p1001_p4) }
 0x5e2   : > { %1611 = vmatprep.subr.bf16.mxu1 (!%p1001_p4), %v1953_v22  ;;  %1589 = vmatprep.mubr.msk.f32.mxu1 (!%p1001_p4), %vm1952_vm8, %v1951_v20  ;;  %v1615_v28 = vpack.c.bf16 (!%p1001_p4), %v1057_v25, %v1056_v24  ;;  %v1618_v32 = vpack.c.bf16 (!%p1001_p4), %v1059_v30, %v1058_v29  ;;  %v1060_v33 = vld [vmem:[%s2389_s9 + $0x30] sm:$0xff] (!%p1001_p4)  ;;  %v1061_v34 = vld [vmem:[%s2389_s9 + $0x38] sm:$0xff] (!%p1001_p4)  ;;  %v1005_v37 = vld [vmem:[#allocation10] sm:$0x1] (!%p1001_p4) }
 0x5e3   : > { %v1006_v19 = vld [vmem:[#allocation4] sm:$0xff] (!%p1001_p4)  ;;  %v1007_v26 = vld [vmem:[#allocation4 + $0x8] sm:$0xff] (!%p1001_p4)  ;;  %1613 = vmatpush3.bf16.msra.mxu1 (!%p1001_p4), %v1612_v27  ;;  %v1008_v31 = vld [vmem:[#allocation4 + $0x10] sm:$0xff] (!%p1001_p4)  ;;  %v1621_v36 = vpack.c.bf16 (!%p1001_p4), %v1061_v34, %v1060_v33 }
 0x5e4   : > { %1546 = vmatpush3.bf16.msra.mxu0 (!%p1001_p4), %v1006_v19  ;;  %1614 = vmatprep.subr.bf16.mxu1 (!%p1001_p4), %v1953_v22  ;;  %v1009_v35 = vld [vmem:[#allocation4 + $0x18] sm:$0xff] (!%p1001_p4)  ;;  %v1062_v38 = vld [vmem:[%s2389_s9 + $0x40] sm:$0xff] (!%p1001_p4)  ;;  %v1063_v39 = vld [vmem:[%s2389_s9 + $0x48] sm:$0xff] (!%p1001_p4) }
 0x5e5   : > { %1547 = vmatprep.subr.bf16.mxu0 (!%p1001_p4), %v1951_v20  ;;  %v1624_v40 = vpack.c.bf16 (!%p1001_p4), %v1063_v39, %v1062_v38  ;;  %v1064_v41 = vld [vmem:[%s2389_s9 + $0x50] sm:$0xff] (!%p1001_p4)  ;;  %v1065_v42 = vld [vmem:[%s2389_s9 + $0x58] sm:$0xff] (!%p1001_p4)  ;;  %v1066_v44 = vld [vmem:[%s2389_s9 + $0x60] sm:$0xff] (!%p1001_p4) }
 0x5e6   : > { %v1627_v43 = vpack.c.bf16 (!%p1001_p4), %v1065_v42, %v1064_v41  ;;  %v1067_v45 = vld [vmem:[%s2389_s9 + $0x68] sm:$0xff] (!%p1001_p4)  ;;  %v1068_v47 = vld [vmem:[%s2389_s9 + $0x70] sm:$0xff] (!%p1001_p4)  ;;  %v1069_v48 = vld [vmem:[%s2389_s9 + $0x78] sm:$0xff] (!%p1001_p4) }
 0x5e7   : > { %1616 = vmatpush3.bf16.msra.mxu1 (!%p1001_p4), %v1615_v28  ;;  %v1630_v46 = vpack.c.bf16 (!%p1001_p4), %v1067_v45, %v1066_v44  ;;  %v1633_v49 = vpack.c.bf16 (!%p1001_p4), %v1069_v48, %v1068_v47  ;;  %v1148_v50 = vld [vmem:[%s2391_s11] sm:$0xff] (!%p1001_p4)  ;;  %v1149_v51 = vld [vmem:[%s2391_s11 + $0x8] sm:$0xff] (!%p1001_p4)  ;;  %v1150_v52 = vld [vmem:[%s2391_s11 + $0x10] sm:$0xff] (!%p1001_p4) }
 0x5e8   : > { %1548 = vmatpush3.bf16.msra.mxu0 %v1007_v26  ;;  %1617 = vmatprep.subr.bf16.mxu1 %v1953_v22  ;;  %v1636_v53 = vpack.c.bf16 %v1149_v51, %v1148_v50  ;;  %v1151_v54 = vld [vmem:[%s2391_s11 + $0x18] sm:$0xff]  ;;  %v1152_v56 = vld [vmem:[%s2391_s11 + $0x20] sm:$0xff]  ;;  %v1153_v57 = vld [vmem:[%s2391_s11 + $0x28] sm:$0xff] }
 0x5e9   : > { %1549 = vmatprep.subr.bf16.mxu0 %v1951_v20  ;;  %v1639_v55 = vpack.c.bf16 %v1151_v54, %v1150_v52  ;;  %v1642_v58 = vpack.c.bf16 %v1153_v57, %v1152_v56  ;;  %v1154_v63 = vld [vmem:[%s2391_s11 + $0x30] sm:$0xff]  ;;  %v1155_v0 = vld [vmem:[%s2391_s11 + $0x38] sm:$0xff]  ;;  %v1387_v2 = vld [vmem:[%s2390_s10] ss:$0 sm:$0xff] }
 0x5ea   : > { %v1645_v1 = vpack.c.bf16 %v1155_v0, %v1154_v63  ;;  %v1388_v7 = vld [vmem:[%s2420_s30] ss:$0 sm:$0xff] }
 0x5eb   : > { %1619 = vmatpush3.bf16.msra.mxu1 %v1618_v32 }
 0x5ec   : > { %1550 = vmatpush3.bf16.msra.mxu0 %v1008_v31  ;;  %1620 = vmatprep.subr.bf16.mxu1 %v1953_v22 }
 0x5ed   : > { %1551 = vmatprep.subr.bf16.mxu0 %v1951_v20 }
 0x5ef   : > { %1622 = vmatpush3.bf16.msra.mxu1 %v1621_v36 }
 0x5f0   : > { %1552 = vmatpush3.bf16.msra.mxu0 %v1009_v35  ;;  %1623 = vmatprep.subr.bf16.mxu1 %v1953_v22 }
 0x5f1   : > { %1635 = vmatprep.subr.bf16.mxu0 %v1953_v22 }
 0x5f3   : > { %1554 = vmatmul.mubr.msk.bf16.vlgmr.msra.gmra.mrb[0].mxu0 %vm1010_vm9, %v1005_v37  ;;  %1625 = vmatpush3.bf16.msra.mxu1 %v1624_v40 }
 0x5f4   : > { %1608 = vmatprep.mubr.msk.f32.mxu0 %vm1952_vm8, %v1951_v20  ;;  %1626 = vmatprep.subr.bf16.mxu1 %v1953_v22 }
 0x5f5   : > { %1637 = vmatpush3.bf16.msra.mxu0 %v1636_v53 }
 0x5f6   : > { %1638 = vmatprep.subr.bf16.mxu0 %v1953_v22 }
 0x5f7   : > { %1628 = vmatpush3.bf16.msra.mxu1 %v1627_v43 }
 0x5f8   : > { %1629 = vmatprep.subr.bf16.mxu1 %v1953_v22 }
 0x5f9   : > { %1640 = vmatpush3.bf16.msra.mxu0 %v1639_v55 }
 0x5fa   : > { %1641 = vmatprep.subr.bf16.mxu0 %v1953_v22 }
 0x5fb   : > { %1631 = vmatpush3.bf16.msra.mxu1 %v1630_v46 }
 0x5fc   : > { %1632 = vmatprep.subr.bf16.mxu1 %v1953_v22 }
 0x5fd   : > { %1643 = vmatpush3.bf16.msra.mxu0 %v1642_v58 }
 0x5fe   : > { %1644 = vmatprep.subr.bf16.mxu0 %v1953_v22 }
 0x5ff   : > { %1634 = vmatpush3.bf16.msra.mxu1 %v1633_v49 }
 0x601   : > { %1646 = vmatpush3.bf16.msra.mxu0 %v1645_v1 }
 0x6c6   : > { %v1048_v59 = vpop.f32.mrb[0].mxu0 }
 0x6c7   : > { %v1555_v60 = vpop.f32.mrb[1].mxu0  ;;  %1590 = vmatmul.mubr.f32.vlgmr.msra.gmra.mrb[0].mxu1 %v1048_v59 }
 0x6c8   : > { %v1051_v61 = vpop.f32.mrb[2].mxu0 }
 0x6c9   : > { %v1556_v62 = vpop.f32.mrb[3].mxu0 }
 0x79a   : > { %v1143_v3 = vpop.f32.mrb[0].mxu1 }
 0x79b   : > { %v1144_v4 = vadd.f32 %v1387_v2, %v1143_v3  ;;  %v1591_v5 = vpop.f32.mrb[1].mxu1 }
 0x79d   : > { %v1147_v6 = vmax.f32 %v1144_v4, 0.0 }
 0x79f   : > { %1609 = vmatmul.mubr.msk.f32.vlgmr.msra.gmra.mrb[4].mxu0 %vm1010_vm9, %v1147_v6 }
 0x872   : > { %v1232_v8 = vpop.f32.mrb[4].mxu0 }
 0x873   : > { %v1233_v9 = vadd.f32 %v1388_v7, %v1232_v8  ;;  %v1610_v10 = vpop.f32.mrb[5].mxu0 }
 0x875   : > { %1236 = vst [vmem:[#allocation11] sm:$0x3] %v1233_v9 }
 0x876 PF: > { %s2421_s14 = sld [smem:[#allocation17_spill]]  ;;  %s1954_s23 = smov [#allocation11]  }
 0x877   : > { %s1244_s7 = sshll.u32 %s1954_s23, 4  ;;  %s1245_s7 = int_to_ptr.vmem [resolvable:$true] %s1244_s7 }
 0x878   : > { %s1852_s19 = scalar_lea.vmem %s1245_s7, 32  ;;  %p1859_p5 = scmp.lt.s32.totalorder %s1245_s7, %s1245_s7 }
 0x879   : > { %p1853_p2 = scmp.ne.s32.totalorder %s1245_s7, %s1852_s19  ;;  %p1860_p8 = scmp.lt.s32.totalorder %s1852_s19, %s1852_s19 }
 0x87b   : > { %p1861_p9 = por %p1860_p8, %p1859_p5 }
 0x87c   : > { %s2422_s20 = sadd.s32 4294967295, %s2421_s14  }
 0x87d   : > { %p2339_p7 = scmp.eq.s32.totalorder %s2422_s20, 11 }
 0x87f   : > { %p1854_p3 = pnand %p1853_p2, %p2339_p7 }
 0x881   : > { %p1855_p6 = pneg %p1854_p3 }
 0x883   : > { %p1862_p10 = pnand %p1861_p9, %p1855_p6 }
 0x885   : > { %1865 = shalt.err (!%p1862_p10)
}
 0x886   : > { %s2424_s15 = sld [smem:[#allocation22_spill]] }
 0x88c   : > { %s1866_s28 = scalar_lea.hbm %s2424_s15, 32 }
 0x88d   : > { %p1867_p11 = scmp.ne.s32.totalorder %s2424_s15, %s1866_s28  ;;  %p1872_p0 = scmp.lt.u32.totalorder %s1866_s28, %s2424_s15 }
 0x88f   : > { %p1868_p12 = pnand %p1867_p11, %p2339_p7 }
 0x891   : > { %p1869_p13 = pneg %p1868_p12 }
 0x893   : > { %p1874_p1 = pnand %p1872_p0, %p1869_p13 }
 0x895   : > { %1877 = shalt.err (!%p1874_p1)
}
 0x896   : > { %1660 = dma.vmem_to_hbm [thread:$0]  (%p2339_p7), %s1245_s7, 32, %s2424_s15, [#allocation7]  }
 0x897   : > { %1911 = dma.done.wait (%p2339_p7), [#allocation7], 32  }
 0x898   : > { %1913 = vsyncadd (%p2339_p7), [#allocation7], 4294967264 }
 0x899 PF: > { %s2425_s21 = sld [smem:[#allocation17_spill]]  ;;  %s2426_s25 = sld [smem:[#allocation15_spill]] }
 0x89a   : > { %s2427_s26 = sld [smem:[#allocation16_spill]]  ;;  %s2428_s27 = sld [smem:[#allocation18_spill]] }
 0x89b   : > { %s2429_s28 = sld [smem:[#allocation19_spill]] }
 0x89f   : > { %s26_s29 = sadd.s32 1, %s2425_s21  }
 0x8a0   : > { %p23_p4 = scmp.ge.s32.totalorder %s26_s29, 14  }
 0x8a2   :  { %25 = sbr.rel (!%p23_p4) target bundleno = 9 (0x9), region = 155 }
 0x8a9   :  { %1257 = vsyncpa [#allocation6], 1 }
 0x8aa   :  { %1259 = vsyncpa [#allocation6 + $0x1], 1 }
 0x8ab   :  { %1260 = vsyncpa [#allocation9], 1 }
 0x8ac   :  { %1261 = vsyncpa [#allocation7], 1 }
 0x8ad   :  { %1263 = vsyncpa [#allocation7 + $0x1], 1 }

</bundles_post_ra>
